<compile_context>
chip_gen: v7x
topology: tpu7x:2x2x1
jax: 0.10.0
libtpu: 0.0.40
codegen_flags: <defaults>
</compile_context>

<pallas_src>
import functools

import jax
import jax.numpy as jnp
from jax.experimental import pallas as pl
from jax.experimental.pallas import tpu as pltpu


def _layernorm_kernel(alpha_ref, bias_ref, x_ref, o_ref, *, eps):
    # x_ref block: (ROW_TILE, D) — rows of the flattened (B*S, D) input.
    x = x_ref[...].astype(jnp.float32)
    d = x.shape[-1]
    mean = jnp.mean(x, axis=-1, keepdims=True)
    diff = x - mean
    # torch.std: unbiased (Bessel-corrected) estimator.
    var = jnp.sum(diff * diff, axis=-1, keepdims=True) * (1.0 / (d - 1))
    std = jnp.sqrt(var)
    # Per-row reciprocal (EUP) instead of a full-tile divide (VPU); fold alpha
    # into the per-row scale so the epilogue is one broadcast multiply-add.
    inv = pl.reciprocal(std + eps, approx=False)          # (ROW_TILE, 1)
    scale = alpha_ref[0] * inv                            # (ROW_TILE, 1)
    o_ref[...] = (diff * scale + bias_ref[0]).astype(o_ref.dtype)


def _choose_row_tile(rows, d, itemsize, budget_bytes=8 * 1024 * 1024):
    """Largest multiple-of-8 row tile that divides `rows` and fits the VMEM budget.

    Budget accounts for double-buffered input + output tiles (4 buffers).
    Assumes rows % 8 == 0.
    """
    per_row = 4 * d * max(itemsize, 4)
    cap = max(8, budget_bytes // per_row)
    tile = max(8, (min(cap, 2048, rows) // 8) * 8)
    for cand in range(tile, 7, -8):
        if rows % cand == 0:
            return cand
    return 8  # unreachable (8 always divides rows when rows % 8 == 0)


def layer_normalization(x, alpha, bias, *, eps=1e-6):
    """Pallas LayerNormalization matching the PyTorch module.

    x:     (..., D)  — normalization over the last axis
    alpha: (1,)  scalar scale
    bias:  (1,)  scalar shift
    """
    orig_shape = x.shape
    d = orig_shape[-1]
    rows = 1
    for s in orig_shape[:-1]:
        rows *= s

    xf = x.reshape(rows, d)
    itemsize = jnp.dtype(x.dtype).itemsize

    budget = 8 * 1024 * 1024
    cap = max(1, budget // (4 * d * max(itemsize, 4)))

    pad = 0
    if rows % 8 != 0 and rows > cap:
        # Ragged, large row count: pad to a multiple of 8 so we can row-tile.
        pad = (-rows) % 8
        xf = jnp.pad(xf, ((0, pad), (0, 0)))
    padded_rows = rows + pad

    if padded_rows % 8 == 0:
        row_tile = _choose_row_tile(padded_rows, d, itemsize, budget)
    else:
        # Small ragged row count: single full-extent block satisfies the
        # (8,128) rule ("equal the full array dims").
        row_tile = padded_rows

    grid = (padded_rows // row_tile,)

    # TODO(synk): for D < 128 (e.g. the test's D=32) the output last dim is not
    # lane-dense (masked partial stores); packing multiple rows per lane-row
    # would recover ~4x store throughput but complicates the reduction.

    kernel = functools.partial(_layernorm_kernel, eps=eps)
    cost = pl.CostEstimate(
        flops=8 * padded_rows * d,
        transcendentals=2 * padded_rows,           # sqrt + reciprocal per row
        bytes_accessed=2 * padded_rows * d * itemsize,
    )

    out = pl.pallas_call(
        kernel,
        out_shape=jax.ShapeDtypeStruct((padded_rows, d), x.dtype),
        grid_spec=pltpu.PrefetchScalarGridSpec(
            num_scalar_prefetch=0,
            grid=grid,
            in_specs=[
                # scalar parameters live in SMEM, untiled
                pl.BlockSpec(memory_space=pltpu.MemorySpace.SMEM),
                pl.BlockSpec(memory_space=pltpu.MemorySpace.SMEM),
                # row-tiled input: last dim equals full array dim (D),
                # second-last is a multiple of 8 (or the full row extent)
                pl.BlockSpec((row_tile, d), lambda i: (i, 0)),
            ],
            out_specs=pl.BlockSpec((row_tile, d), lambda i: (i, 0)),
        ),
        compiler_params=pltpu.CompilerParams(
            dimension_semantics=("parallel",),
            vmem_limit_bytes=32 * 1024 * 1024,
        ),
        cost_estimate=cost,
    )(alpha, bias, xf)

    if pad:
        out = out[:rows]
    return out.reshape(orig_shape)


class Encoder:
    """JAX mirror of the PyTorch Encoder.

    `layers` is a list of callables with signature layer(x, mask) -> x.
    The reference module gives no concrete layer implementation, so by default
    the list is empty and the Encoder reduces to the final LayerNormalization
    (which is the Pallas hot path).
    """

    def __init__(self, layers=(), eps=1e-6):
        self.layers = list(layers)
        self.eps = eps
        # LayerNormalization parameters: ones(1) / zeros(1), deterministic.
        self.alpha = jnp.ones((1,), dtype=jnp.float32)
        self.bias = jnp.zeros((1,), dtype=jnp.float32)

    def __call__(self, x, mask):
        # TODO(synk): nn.ModuleList contents are abstract in the reference;
        # any provided layers are applied here as plain-JAX callables.
        for layer in self.layers:
            x = layer(x, mask)
        return layer_normalization(x, self.alpha, self.bias, eps=self.eps)


def _reference_layernorm(x, alpha, bias, eps=1e-6):
    """Pure-JAX reference reproducing torch semantics (unbiased std)."""
    x32 = x.astype(jnp.float32)
    mean = jnp.mean(x32, axis=-1, keepdims=True)
    diff = x32 - mean
    var = jnp.sum(diff * diff, axis=-1, keepdims=True) / (x.shape[-1] - 1)
    std = jnp.sqrt(var)
    return (alpha[0] * diff / (std + eps) + bias[0]).astype(x.dtype)


if __name__ == "__main__":
    key = jax.random.PRNGKey(0)
    B, S, D = 2, 8, 32  # batch, seq, hidden
    x = jax.random.normal(key, (B, S, D), dtype=jnp.float32)
    mask = jnp.ones((B, 1, 1, S), dtype=jnp.float32)  # unused (no layers)

    enc = Encoder(layers=())
    out = enc(x, mask)
    out = jax.block_until_ready(out)

    ref = _reference_layernorm(x, enc.alpha, enc.bias)
    assert out.shape == x.shape and out.dtype == x.dtype
    assert jnp.allclose(out, ref, atol=1e-5, rtol=1e-5), "mismatch vs reference"

    print("KERNEL_OK")
</pallas_src>

<mosaic_0001>
module attributes {stable_mosaic.version = 11 : i64} {
  func.func @_layernorm_kernel(%arg0: i32, %arg1: memref<1xf32, #tpu.memory_space<smem>>, %arg2: memref<1xf32, #tpu.memory_space<smem>>, %arg3: memref<16x32xf32, #tpu.memory_space<vmem>>, %arg4: memref<16x32xf32, #tpu.memory_space<vmem>>) attributes {dimension_semantics = [#tpu.dimension_semantics<parallel>], iteration_bounds = array<i64: 1>, scalar_prefetch = 0 : i64, scratch_operands = 0 : i64, tpu.core_type = #tpu.core_type<tc>, window_params = [{transform_indices = @transform_0, window_bounds = array<i64: 1>}, {transform_indices = @transform_1, window_bounds = array<i64: 1>}, {transform_indices = @transform_2, window_bounds = array<i64: 16, 32>}, {transform_indices = @transform_3, window_bounds = array<i64: 16, 32>}]} {
    %c0 = arith.constant 0 : index
    %c0_0 = arith.constant 0 : index
    %0 = vector.load %arg3[%c0, %c0_0] : memref<16x32xf32, #tpu.memory_space<vmem>>, vector<16x32xf32>
    %cst = arith.constant dense<0.000000e+00> : vector<16xf32>
    %1 = vector.multi_reduction <add>, %0, %cst [1] : vector<16x32xf32> to vector<16xf32>
    %2 = vector.shape_cast %1 : vector<16xf32> to vector<16x1xf32>
    %cst_1 = arith.constant 3.200000e+01 : f32
    %3 = vector.broadcast %cst_1 : f32 to vector<16x1xf32>
    %4 = arith.divf %2, %3 : vector<16x1xf32>
    %5 = vector.broadcast %4 : vector<16x1xf32> to vector<16x32xf32>
    %6 = arith.subf %0, %5 : vector<16x32xf32>
    %7 = arith.mulf %6, %6 : vector<16x32xf32>
    %cst_2 = arith.constant dense<0.000000e+00> : vector<16xf32>
    %8 = vector.multi_reduction <add>, %7, %cst_2 [1] : vector<16x32xf32> to vector<16xf32>
    %9 = vector.shape_cast %8 : vector<16xf32> to vector<16x1xf32>
    %cst_3 = arith.constant 0.0322580636 : f32
    %10 = vector.broadcast %cst_3 : f32 to vector<16x1xf32>
    %11 = arith.mulf %9, %10 : vector<16x1xf32>
    %12 = math.sqrt %11 : vector<16x1xf32>
    %cst_4 = arith.constant 9.99999997E-7 : f32
    %13 = vector.broadcast %cst_4 : f32 to vector<16x1xf32>
    %14 = arith.addf %12, %13 : vector<16x1xf32>
    %15 = tpu.reciprocal %14 : vector<16x1xf32> -> vector<16x1xf32>
    %c0_5 = arith.constant 0 : index
    %16 = memref.load %arg1[%c0_5] : memref<1xf32, #tpu.memory_space<smem>>
    %17 = vector.broadcast %16 : f32 to vector<16x1xf32>
    %18 = arith.mulf %17, %15 : vector<16x1xf32>
    %19 = vector.broadcast %18 : vector<16x1xf32> to vector<16x32xf32>
    %20 = arith.mulf %6, %19 : vector<16x32xf32>
    %c0_6 = arith.constant 0 : index
    %21 = memref.load %arg2[%c0_6] : memref<1xf32, #tpu.memory_space<smem>>
    %22 = vector.broadcast %21 : f32 to vector<16x32xf32>
    %23 = arith.addf %20, %22 : vector<16x32xf32>
    %c0_7 = arith.constant 0 : index
    %c0_8 = arith.constant 0 : index
    %24 = vector.load %arg4[%c0_7, %c0_8] : memref<16x32xf32, #tpu.memory_space<vmem>>, vector<16x32xf32>
    tpu.vector_store %arg4[%c0_7, %c0_8], %23 {strides = array<i32>} : memref<16x32xf32, #tpu.memory_space<vmem>>, vector<16x32xf32>,
    return
  }
  func.func @transform_0(%arg0: i32) -> i32 {
    %c0_i32 = arith.constant 0 : i32
    %c0_i32_0 = arith.constant 0 : i32
    return %c0_i32 : i32
  }
  func.func @transform_1(%arg0: i32) -> i32 {
    %c0_i32 = arith.constant 0 : i32
    %c0_i32_0 = arith.constant 0 : i32
    return %c0_i32 : i32
  }
  func.func @transform_2(%arg0: i32) -> (i32, i32) {
    %c0_i32 = arith.constant 0 : i32
    %c0_i32_0 = arith.constant 0 : i32
    return %arg0, %c0_i32 : i32, i32
  }
  func.func @transform_3(%arg0: i32) -> (i32, i32) {
    %c0_i32 = arith.constant 0 : i32
    %c0_i32_0 = arith.constant 0 : i32
    return %arg0, %c0_i32 : i32, i32
  }
}

</mosaic_0001>

<bundles_post_ra>
// kernel: tpu_custom_call.1
= control target key start
LH: loop header
LB: loop body
LE: loop exit
PB: predicated region body
PF: predicated region fallthrough
CT: control target
= control target key end

     0   :  { %10 = vsyncpa [#allocation5], 0  ;;  %s228_s0 = inlined_call_operand.<no memory space> [shape: f32[1], index: 0, kind: input, shape index: {}]   ;;  %s229_s1 = inlined_call_operand.<no memory space> [shape: f32[1], index: 1, kind: input, shape index: {}]   ;;  %s230_s2 = inlined_call_operand.hbm [shape: f32[16,32], index: 2, kind: input, shape index: {}]   ;;  %s231_s3 = inlined_call_operand.hbm [shape: f32[16,32], index: 3, kind: output, shape index: {}]  }
   0x1   :  { %11 = vsyncpa [#allocation6], 0  ;;  %s162_s12 = smov [#allocation4]   ;;  %s114_s16 = scalar_lea.hbm %s230_s2, 256 }
   0x2   :  { %s21_s13 = sshll.u32 %s162_s12, 4  ;;  %p115_p0 = scmp.ne.s32.totalorder %s230_s2, %s114_s16  ;;  %s22_s13 = int_to_ptr.vmem [resolvable:$true] %s21_s13 }
   0x3   :  { %p118_p1 = scmp.lt.u32.totalorder %s114_s16, %s230_s2 }
   0x5   :  { %p120_p2 = pnand %p118_p1, %p115_p0 }
   0x7   :  { %123 = shalt.err (!%p120_p2)
}
   0x8   :  { %s124_s21 = scalar_lea.vmem %s22_s13, 256  ;;  %p129_p4 = scmp.lt.s32.totalorder %s22_s13, %s22_s13 }
   0x9   :  { %p125_p3 = scmp.ne.s32.totalorder %s22_s13, %s124_s21  ;;  %p130_p5 = scmp.lt.s32.totalorder %s124_s21, %s124_s21 }
   0xb   :  { %p131_p6 = por %p130_p5, %p129_p4 }
   0xd   :  { %p132_p7 = pnand %p131_p6, %p125_p3 }
   0xf   :  { %135 = shalt.err (!%p132_p7)
}
  0x10   :  { %s163_s22 = smov 128   ;;  %s164_s23 = smov 8  }
  0x11   :  { %27 = dma.hbm_to_vmem [thread:$0]  %s230_s2, 256, %s22_s13, [#allocation5], %s163_s22, %s163_s22, %s164_s23  }
  0x12   :  { %158 = dma.done.wait [#allocation5], 256  }
  0x13   :  { %159 = vsyncadd [#allocation5], 4294967040  ;;  %vm33_vm0 = vcmask 261120   ;;  %v31_v0 = vld [vmem:[#allocation4] sm:$0xff]  ;;  %v32_v1 = vld [vmem:[#allocation4 + $0x8] sm:$0xff]  ;;  %v74_v30 = vstv %s228_s0  ;;  %v80_v33 = vstv %s229_s1  ;;  %s165_s29 = smov [#allocation7]  }
  0x14   :  { %v34_v2 = vsel %vm33_vm0, %v31_v0, 0.0  ;;  %v37_v3 = vsel %vm33_vm0, %v32_v1, 0.0  ;;  %s90_s30 = sshll.u32 %s165_s29, 4  ;;  %s91_s30 = int_to_ptr.vmem [resolvable:$true] %s90_s30 }
  0x15   :  { %35 = vadd.xlane.f32.xlu0 %v34_v2  ;;  %s136_s0 = scalar_lea.vmem %s91_s30, 256  ;;  %p141_p9 = scmp.lt.s32.totalorder %s91_s30, %s91_s30 }
  0x16   :  { %p137_p8 = scmp.ne.s32.totalorder %s91_s30, %s136_s0  ;;  %p142_p10 = scmp.lt.s32.totalorder %s136_s0, %s136_s0 }
  0x18   :  { %p143_p11 = por %p142_p10, %p141_p9 }
  0x19   :  { %38 = vadd.xlane.f32.xlu0 %v37_v3 }
  0x1a   :  { %p144_p12 = pnand %p143_p11, %p137_p8 }
  0xa2   :  { %v36_v4 = vpop.xlane.xlu0 %35 }
  0xa3   :  { %v41_v5 = vmul.f32 0.03125, %v36_v4 }
  0xa5   :  { %v43_v6 = vsub.f32 %v31_v0, %v41_v5 }
  0xa6   :  { %v39_v7 = vpop.xlane.xlu0 %38 }
  0xa7   :  { %v42_v8 = vmul.f32 0.03125, %v39_v7  ;;  %v45_v9 = vmul.f32 %v43_v6, %v43_v6 }
  0xa9   :  { %v44_v10 = vsub.f32 %v32_v1, %v42_v8  ;;  %v47_v11 = vsel %vm33_vm0, %v45_v9, 0.0 }
  0xaa   :  { %48 = vadd.xlane.f32.xlu1 %v47_v11 }
  0xab   :  { %v46_v12 = vmul.f32 %v44_v10, %v44_v10 }
  0xad   :  { %v50_v13 = vsel %vm33_vm0, %v46_v12, 0.0 }
  0xae   :  { %51 = vadd.xlane.f32.xlu1 %v50_v13 }
 0x137   :  { %v49_v14 = vpop.xlane.xlu1 %48 }
 0x138   :  { %v53_v15 = vmul.f32 0.032258064, %v49_v14 }
 0x13a   :  { %106 = vrsqrt.f32 %v53_v15  ;;  %vm57_vm1 = vcmp.eq.f32.partialorder %v53_v15, inf  ;;  %v60_v20 = vand.u32 2147483648, %v53_v15  ;;  %vm59_vm2 = vcmp.eq.f32.partialorder %v53_v15, 0.0 }
 0x13b   :  { %v52_v16 = vpop.xlane.xlu1 %51 }
 0x13c   :  { %v54_v17 = vmul.f32 0.032258064, %v52_v16 }
 0x13e   :  { %108 = vrsqrt.f32 %v54_v17  ;;  %vm64_vm3 = vcmp.eq.f32.partialorder %v54_v17, inf  ;;  %v67_v26 = vand.u32 2147483648, %v54_v17  ;;  %vm66_vm4 = vcmp.eq.f32.partialorder %v54_v17, 0.0 }
 0x144   :  { %v107_v18 = vpop.eup %106 }
 0x145   :  { %v56_v19 = vmul.f32 %v107_v18, %v53_v15 }
 0x147   :  { %v58_v21 = vsel %vm57_vm1, %v53_v15, %v56_v19 }
 0x148   :  { %v109_v22 = vpop.eup %108  ;;  %v61_v23 = vsel %vm59_vm2, %v60_v20, %v58_v21 }
 0x149   :  { %v69_v24 = vadd.f32 1e-06, %v61_v23  ;;  %v63_v25 = vmul.f32 %v109_v22, %v54_v17 }
 0x14b   :  { %110 = vrcp.f32 %v69_v24  ;;  %v65_v27 = vsel %vm64_vm3, %v54_v17, %v63_v25 }
 0x14c   :  { %v68_v28 = vsel %vm66_vm4, %v67_v26, %v65_v27 }
 0x14d   :  { %v70_v29 = vadd.f32 1e-06, %v68_v28 }
 0x14f   :  { %112 = vrcp.f32 %v70_v29 }
 0x155   :  { %v111_v31 = vpop.eup %110 }
 0x156   :  { %v75_v32 = vmul.f32 %v111_v31, %v74_v30 }
 0x158   :  { %v77_v34 = vmul.f32 %v75_v32, %v43_v6 }
 0x159   :  { %v113_v35 = vpop.eup %112 }
 0x15a   :  { %v76_v36 = vmul.f32 %v113_v35, %v74_v30  ;;  %v81_v37 = vadd.f32 %v80_v33, %v77_v34 }
 0x15c   :  { %v78_v38 = vmul.f32 %v76_v36, %v44_v10  ;;  %83 = vst.msk [vmem:[#allocation7] sm:$0xff] %vm33_vm0, %v81_v37 }
 0x15e   :  { %v82_v39 = vadd.f32 %v80_v33, %v78_v38 }
 0x160   :  { %84 = vst.msk [vmem:[#allocation7 + $0x8] sm:$0xff] %vm33_vm0, %v82_v39 }
 0x161   :  { %147 = shalt.err (!%p144_p12)
}
 0x162   :  { %s148_s5 = scalar_lea.hbm %s231_s3, 256 }
 0x163   :  { %p149_p13 = scmp.ne.s32.totalorder %s231_s3, %s148_s5  ;;  %p152_p0 = scmp.lt.u32.totalorder %s148_s5, %s231_s3 }
 0x165   :  { %p154_p1 = pnand %p152_p0, %p149_p13 }
 0x167   :  { %157 = shalt.err (!%p154_p1)
}
 0x168   :  { %96 = dma.vmem_to_hbm [thread:$0]  %s91_s30, 256, %s231_s3, [#allocation6], %s163_s22, %s163_s22, %s164_s23  }
 0x169   :  { %160 = dma.done.wait [#allocation6], 256  }
 0x16a   :  { %161 = vsyncadd [#allocation6], 4294967040 }
 0x16b   :  { %100 = vsyncpa [#allocation5], 1 }
 0x16c   :  { %101 = vsyncpa [#allocation6], 1 }

</bundles_post_ra>
